<compile_context>
chip_gen: v7x
topology: tpu7x:2x2x1
jax: 0.10.0
libtpu: 0.0.40
codegen_flags: <defaults>
</compile_context>

<pallas_src>
import jax
import jax.numpy as jnp
from jax.experimental import pallas as pl
from jax.experimental.pallas import tpu as pltpu

# ---------------- configuration (tile-friendly sizes) ----------------
TEXT_VOCAB = 256     # text token vocabulary
FUNC_VOCAB = 128     # function token vocabulary (== prediction size)
D_COND = 128         # conditioner embedding width
D_FUNC = 128         # generator token-embedding width
HIDDEN = 128         # generator MLP hidden width
TEXT_LEN = 8         # text sequence length
FUNC_LEN = 8         # prev_func_list length
LANES = 128

# --- parameter-slab row offsets (all segment starts are 8-row aligned) ---
R_TEXT_TAB = 0
R_FUNC_TAB = R_TEXT_TAB + TEXT_VOCAB            # 256
R_WC = R_FUNC_TAB + FUNC_VOCAB                  # 384
R_W1 = R_WC + D_COND                            # 512   (fused [2*D, H])
R_W2 = R_W1 + (D_COND + D_FUNC)                 # 768
R_BIAS = R_W2 + HIDDEN                          # 896
R_BC, R_B1, R_B2 = R_BIAS, R_BIAS + 1, R_BIAS + 2
SLAB_ROWS = R_BIAS + 8                          # 904


# ------------------------------ Pallas kernel -------------------------------
def _model_kernel(text_ids_ref, func_ids_ref, w_ref, out_ref):
    tb = out_ref.shape[0]

    text_ids = text_ids_ref[...]                 # [TB, T] int32
    func_ids = func_ids_ref[...]                 # [TB, L] int32

    # ---- embedding gather + mean-pool as (counts/T) @ table on the MXU ----
    iota_tv = jax.lax.broadcasted_iota(jnp.int32, (tb, TEXT_VOCAB), 1)
    t_counts = jnp.zeros((tb, TEXT_VOCAB), jnp.float32)
    for t in range(TEXT_LEN):                    # static unroll, 8 compares
        t_counts += (text_ids[:, t:t + 1] == iota_tv).astype(jnp.float32)

    iota_fv = jax.lax.broadcasted_iota(jnp.int32, (tb, FUNC_VOCAB), 1)
    f_counts = jnp.zeros((tb, FUNC_VOCAB), jnp.float32)
    for t in range(FUNC_LEN):
        f_counts += (func_ids[:, t:t + 1] == iota_fv).astype(jnp.float32)

    text_table = w_ref[R_TEXT_TAB:R_FUNC_TAB, :]           # bf16 [256,128]
    func_table = w_ref[R_FUNC_TAB:R_WC, :]                 # bf16 [128,128]

    text_pool = jnp.dot((t_counts * (1.0 / TEXT_LEN)).astype(jnp.bfloat16),
                        text_table, preferred_element_type=jnp.float32)   # [TB, Dc]
    func_pool = jnp.dot((f_counts * (1.0 / FUNC_LEN)).astype(jnp.bfloat16),
                        func_table, preferred_element_type=jnp.float32)   # [TB, Df]

    # ---- Conditioner projection + tanh ----
    bc = w_ref[R_BC:R_BC + 1, :].astype(jnp.float32)                      # [1,128]
    cond = jnp.tanh(
        jnp.dot(text_pool.astype(jnp.bfloat16), w_ref[R_WC:R_W1, :],
                preferred_element_type=jnp.float32) + bc)                 # [TB, Dc]

    # ---- Generator conditioned MLP: single fused hidden matmul ----
    h_in = jnp.concatenate([cond, func_pool], axis=1).astype(jnp.bfloat16)  # [TB, 2*Dc]
    b1 = w_ref[R_B1:R_B1 + 1, :].astype(jnp.float32)
    h = jnp.dot(h_in, w_ref[R_W1:R_W2, :],
                preferred_element_type=jnp.float32) + b1                  # [TB, H]
    h = jnp.maximum(h, 0.0)

    b2 = w_ref[R_B2:R_B2 + 1, :].astype(jnp.float32)
    logits = jnp.dot(h.astype(jnp.bfloat16), w_ref[R_W2:R_BIAS, :],
                     preferred_element_type=jnp.float32) + b2             # [TB, V]
    out_ref[...] = logits.astype(out_ref.dtype)


def synth_forward(text_ids, func_ids, w_slab):
    """Fused conditioner+generator forward for a batch of examples."""
    B = text_ids.shape[0]
    tile_b = 128 if B % 128 == 0 else 8
    assert B % tile_b == 0, "batch must be a multiple of 8"
    grid = (B // tile_b,)
    return pl.pallas_call(
        _model_kernel,
        out_shape=jax.ShapeDtypeStruct((B, FUNC_VOCAB), jnp.float32),
        grid=grid,
        in_specs=[
            pl.BlockSpec((tile_b, TEXT_LEN), lambda i: (i, 0)),
            pl.BlockSpec((tile_b, FUNC_LEN), lambda i: (i, 0)),
            # constant block index -> weight slab stays VMEM-resident across steps
            pl.BlockSpec((SLAB_ROWS, LANES), lambda i: (0, 0)),
        ],
        out_specs=pl.BlockSpec((tile_b, FUNC_VOCAB), lambda i: (i, 0)),
        compiler_params=pltpu.CompilerParams(
            dimension_semantics=("parallel",)),
    )(text_ids, func_ids, w_slab)


model_forward = jax.jit(synth_forward)


# ------------------------------ params / packing -----------------------------
def init_params(key):
    ks = jax.random.split(key, 8)

    def w(k, shape, fan_in):
        return (jax.random.normal(k, shape, jnp.float32)
                / jnp.sqrt(fan_in)).astype(jnp.bfloat16)

    return {
        # Conditioner (frozen in the reference model)
        "text_table": w(ks[0], (TEXT_VOCAB, D_COND), 1.0),
        "wc": w(ks[1], (D_COND, D_COND), D_COND),
        "bc": w(ks[2], (1, D_COND), D_COND),
        # Generator
        "func_table": w(ks[3], (FUNC_VOCAB, D_FUNC), 1.0),
        "w1": w(ks[4], (D_COND + D_FUNC, HIDDEN), D_COND + D_FUNC),  # fused [Wc||Wf]
        "b1": w(ks[5], (1, HIDDEN), HIDDEN),
        "w2": w(ks[6], (HIDDEN, FUNC_VOCAB), HIDDEN),
        "b2": w(ks[7], (1, FUNC_VOCAB), FUNC_VOCAB),
    }


def pack_params(params):
    """Packs every table/weight/bias into one bf16 [SLAB_ROWS, 128] slab."""
    bias_block = jnp.zeros((8, LANES), jnp.bfloat16)
    bias_block = bias_block.at[0].set(params["bc"].reshape(-1))
    bias_block = bias_block.at[1].set(params["b1"].reshape(-1))
    bias_block = bias_block.at[2].set(params["b2"].reshape(-1))
    slab = jnp.concatenate(
        [params["text_table"], params["func_table"], params["wc"],
         params["w1"], params["w2"], bias_block], axis=0)
    assert slab.shape == (SLAB_ROWS, LANES)
    return slab


# --------------------------- pure-JAX reference ------------------------------
def model_forward_ref(text_ids, func_ids, params):
    text_emb = jnp.take(params["text_table"], text_ids, axis=0).astype(jnp.float32)
    func_emb = jnp.take(params["func_table"], func_ids, axis=0).astype(jnp.float32)
    text_pool = jnp.mean(text_emb, axis=1)
    func_pool = jnp.mean(func_emb, axis=1)
    cond = jnp.tanh(
        jnp.dot(text_pool.astype(jnp.bfloat16), params["wc"],
                preferred_element_type=jnp.float32)
        + params["bc"].astype(jnp.float32))
    h_in = jnp.concatenate([cond, func_pool], axis=1).astype(jnp.bfloat16)
    h = jnp.maximum(
        jnp.dot(h_in, params["w1"], preferred_element_type=jnp.float32)
        + params["b1"].astype(jnp.float32), 0.0)
    return (jnp.dot(h.astype(jnp.bfloat16), params["w2"],
                    preferred_element_type=jnp.float32)
            + params["b2"].astype(jnp.float32))


if __name__ == "__main__":
    key = jax.random.PRNGKey(0)
    pkey, tkey, fkey = jax.random.split(key, 3)

    params = init_params(pkey)
    w_slab = pack_params(params)

    B = 16  # batch of (text, prev_func_list) examples; grid = (2,) of 8-row tiles
    text_tokens = jax.random.randint(tkey, (B, TEXT_LEN), 0, TEXT_VOCAB, dtype=jnp.int32)
    prev_func_list = jax.random.randint(fkey, (B, FUNC_LEN), 0, FUNC_VOCAB, dtype=jnp.int32)

    prediction = model_forward(text_tokens, prev_func_list, w_slab)
    jax.block_until_ready(prediction)

    ref = model_forward_ref(text_tokens, prev_func_list, params)
    assert prediction.shape == (B, FUNC_VOCAB)
    assert jnp.allclose(prediction, ref, atol=1e-2, rtol=1e-2), \
        float(jnp.max(jnp.abs(prediction - ref)))

    print("KERNEL_OK")
</pallas_src>

<mosaic_0001>
module attributes {stable_mosaic.version = 11 : i64} {
  func.func @_model_kernel(%arg0: i32, %arg1: memref<8x8xi32, #tpu.memory_space<vmem>>, %arg2: memref<8x8xi32, #tpu.memory_space<vmem>>, %arg3: memref<904x128xbf16, #tpu.memory_space<vmem>>, %arg4: memref<8x128xf32, #tpu.memory_space<vmem>>) attributes {dimension_semantics = [#tpu.dimension_semantics<parallel>], iteration_bounds = array<i64: 2>, scalar_prefetch = 0 : i64, scratch_operands = 0 : i64, tpu.core_type = #tpu.core_type<tc>, window_params = [{transform_indices = @transform_0, window_bounds = array<i64: 8, 8>}, {transform_indices = @transform_1, window_bounds = array<i64: 8, 8>}, {pipeline_mode = #tpu.pipeline_mode<synchronous>, transform_indices = @transform_2, window_bounds = array<i64: 904, 128>}, {transform_indices = @transform_3, window_bounds = array<i64: 8, 128>}]} {
    %c0 = arith.constant 0 : index
    %c0_0 = arith.constant 0 : index
    %0 = vector.load %arg1[%c0, %c0_0] : memref<8x8xi32, #tpu.memory_space<vmem>>, vector<8x8xi32>
    %c0_1 = arith.constant 0 : index
    %c0_2 = arith.constant 0 : index
    %1 = vector.load %arg2[%c0_1, %c0_2] : memref<8x8xi32, #tpu.memory_space<vmem>>, vector<8x8xi32>
    %2 = tpu.iota {dimensions = array<i32: 1>} : vector<8x256xi32>
    %cst = arith.constant 0.000000e+00 : f32
    %3 = vector.broadcast %cst : f32 to vector<8x256xf32>
    %4 = vector.extract_strided_slice %0 {offsets = [0, 0], sizes = [8, 1], strides = [1, 1]} : vector<8x8xi32> to vector<8x1xi32>
    %5 = vector.broadcast %4 : vector<8x1xi32> to vector<8x256xi32>
    %6 = arith.cmpi eq, %5, %2 : vector<8x256xi32>
    %7 = arith.extui %6 : vector<8x256xi1> to vector<8x256xi32>
    %8 = arith.sitofp %7 : vector<8x256xi32> to vector<8x256xf32>
    %9 = arith.addf %3, %8 : vector<8x256xf32>
    %10 = vector.extract_strided_slice %0 {offsets = [0, 1], sizes = [8, 1], strides = [1, 1]} : vector<8x8xi32> to vector<8x1xi32>
    %11 = vector.broadcast %10 : vector<8x1xi32> to vector<8x256xi32>
    %12 = arith.cmpi eq, %11, %2 : vector<8x256xi32>
    %13 = arith.extui %12 : vector<8x256xi1> to vector<8x256xi32>
    %14 = arith.sitofp %13 : vector<8x256xi32> to vector<8x256xf32>
    %15 = arith.addf %9, %14 : vector<8x256xf32>
    %16 = vector.extract_strided_slice %0 {offsets = [0, 2], sizes = [8, 1], strides = [1, 1]} : vector<8x8xi32> to vector<8x1xi32>
    %17 = vector.broadcast %16 : vector<8x1xi32> to vector<8x256xi32>
    %18 = arith.cmpi eq, %17, %2 : vector<8x256xi32>
    %19 = arith.extui %18 : vector<8x256xi1> to vector<8x256xi32>
    %20 = arith.sitofp %19 : vector<8x256xi32> to vector<8x256xf32>
    %21 = arith.addf %15, %20 : vector<8x256xf32>
    %22 = vector.extract_strided_slice %0 {offsets = [0, 3], sizes = [8, 1], strides = [1, 1]} : vector<8x8xi32> to vector<8x1xi32>
    %23 = vector.broadcast %22 : vector<8x1xi32> to vector<8x256xi32>
    %24 = arith.cmpi eq, %23, %2 : vector<8x256xi32>
    %25 = arith.extui %24 : vector<8x256xi1> to vector<8x256xi32>
    %26 = arith.sitofp %25 : vector<8x256xi32> to vector<8x256xf32>
    %27 = arith.addf %21, %26 : vector<8x256xf32>
    %28 = vector.extract_strided_slice %0 {offsets = [0, 4], sizes = [8, 1], strides = [1, 1]} : vector<8x8xi32> to vector<8x1xi32>
    %29 = vector.broadcast %28 : vector<8x1xi32> to vector<8x256xi32>
    %30 = arith.cmpi eq, %29, %2 : vector<8x256xi32>
    %31 = arith.extui %30 : vector<8x256xi1> to vector<8x256xi32>
    %32 = arith.sitofp %31 : vector<8x256xi32> to vector<8x256xf32>
    %33 = arith.addf %27, %32 : vector<8x256xf32>
    %34 = vector.extract_strided_slice %0 {offsets = [0, 5], sizes = [8, 1], strides = [1, 1]} : vector<8x8xi32> to vector<8x1xi32>
    %35 = vector.broadcast %34 : vector<8x1xi32> to vector<8x256xi32>
    %36 = arith.cmpi eq, %35, %2 : vector<8x256xi32>
    %37 = arith.extui %36 : vector<8x256xi1> to vector<8x256xi32>
    %38 = arith.sitofp %37 : vector<8x256xi32> to vector<8x256xf32>
    %39 = arith.addf %33, %38 : vector<8x256xf32>
    %40 = vector.extract_strided_slice %0 {offsets = [0, 6], sizes = [8, 1], strides = [1, 1]} : vector<8x8xi32> to vector<8x1xi32>
    %41 = vector.broadcast %40 : vector<8x1xi32> to vector<8x256xi32>
    %42 = arith.cmpi eq, %41, %2 : vector<8x256xi32>
    %43 = arith.extui %42 : vector<8x256xi1> to vector<8x256xi32>
    %44 = arith.sitofp %43 : vector<8x256xi32> to vector<8x256xf32>
    %45 = arith.addf %39, %44 : vector<8x256xf32>
    %46 = vector.extract_strided_slice %0 {offsets = [0, 7], sizes = [8, 1], strides = [1, 1]} : vector<8x8xi32> to vector<8x1xi32>
    %47 = vector.broadcast %46 : vector<8x1xi32> to vector<8x256xi32>
    %48 = arith.cmpi eq, %47, %2 : vector<8x256xi32>
    %49 = arith.extui %48 : vector<8x256xi1> to vector<8x256xi32>
    %50 = arith.sitofp %49 : vector<8x256xi32> to vector<8x256xf32>
    %51 = arith.addf %45, %50 : vector<8x256xf32>
    %52 = tpu.iota {dimensions = array<i32: 1>} : vector<8x128xi32>
    %cst_3 = arith.constant 0.000000e+00 : f32
    %53 = vector.broadcast %cst_3 : f32 to vector<8x128xf32>
    %54 = vector.extract_strided_slice %1 {offsets = [0, 0], sizes = [8, 1], strides = [1, 1]} : vector<8x8xi32> to vector<8x1xi32>
    %55 = vector.broadcast %54 : vector<8x1xi32> to vector<8x128xi32>
    %56 = arith.cmpi eq, %55, %52 : vector<8x128xi32>
    %57 = arith.extui %56 : vector<8x128xi1> to vector<8x128xi32>
    %58 = arith.sitofp %57 : vector<8x128xi32> to vector<8x128xf32>
    %59 = arith.addf %53, %58 : vector<8x128xf32>
    %60 = vector.extract_strided_slice %1 {offsets = [0, 1], sizes = [8, 1], strides = [1, 1]} : vector<8x8xi32> to vector<8x1xi32>
    %61 = vector.broadcast %60 : vector<8x1xi32> to vector<8x128xi32>
    %62 = arith.cmpi eq, %61, %52 : vector<8x128xi32>
    %63 = arith.extui %62 : vector<8x128xi1> to vector<8x128xi32>
    %64 = arith.sitofp %63 : vector<8x128xi32> to vector<8x128xf32>
    %65 = arith.addf %59, %64 : vector<8x128xf32>
    %66 = vector.extract_strided_slice %1 {offsets = [0, 2], sizes = [8, 1], strides = [1, 1]} : vector<8x8xi32> to vector<8x1xi32>
    %67 = vector.broadcast %66 : vector<8x1xi32> to vector<8x128xi32>
    %68 = arith.cmpi eq, %67, %52 : vector<8x128xi32>
    %69 = arith.extui %68 : vector<8x128xi1> to vector<8x128xi32>
    %70 = arith.sitofp %69 : vector<8x128xi32> to vector<8x128xf32>
    %71 = arith.addf %65, %70 : vector<8x128xf32>
    %72 = vector.extract_strided_slice %1 {offsets = [0, 3], sizes = [8, 1], strides = [1, 1]} : vector<8x8xi32> to vector<8x1xi32>
    %73 = vector.broadcast %72 : vector<8x1xi32> to vector<8x128xi32>
    %74 = arith.cmpi eq, %73, %52 : vector<8x128xi32>
    %75 = arith.extui %74 : vector<8x128xi1> to vector<8x128xi32>
    %76 = arith.sitofp %75 : vector<8x128xi32> to vector<8x128xf32>
    %77 = arith.addf %71, %76 : vector<8x128xf32>
    %78 = vector.extract_strided_slice %1 {offsets = [0, 4], sizes = [8, 1], strides = [1, 1]} : vector<8x8xi32> to vector<8x1xi32>
    %79 = vector.broadcast %78 : vector<8x1xi32> to vector<8x128xi32>
    %80 = arith.cmpi eq, %79, %52 : vector<8x128xi32>
    %81 = arith.extui %80 : vector<8x128xi1> to vector<8x128xi32>
    %82 = arith.sitofp %81 : vector<8x128xi32> to vector<8x128xf32>
    %83 = arith.addf %77, %82 : vector<8x128xf32>
    %84 = vector.extract_strided_slice %1 {offsets = [0, 5], sizes = [8, 1], strides = [1, 1]} : vector<8x8xi32> to vector<8x1xi32>
    %85 = vector.broadcast %84 : vector<8x1xi32> to vector<8x128xi32>
    %86 = arith.cmpi eq, %85, %52 : vector<8x128xi32>
    %87 = arith.extui %86 : vector<8x128xi1> to vector<8x128xi32>
    %88 = arith.sitofp %87 : vector<8x128xi32> to vector<8x128xf32>
    %89 = arith.addf %83, %88 : vector<8x128xf32>
    %90 = vector.extract_strided_slice %1 {offsets = [0, 6], sizes = [8, 1], strides = [1, 1]} : vector<8x8xi32> to vector<8x1xi32>
    %91 = vector.broadcast %90 : vector<8x1xi32> to vector<8x128xi32>
    %92 = arith.cmpi eq, %91, %52 : vector<8x128xi32>
    %93 = arith.extui %92 : vector<8x128xi1> to vector<8x128xi32>
    %94 = arith.sitofp %93 : vector<8x128xi32> to vector<8x128xf32>
    %95 = arith.addf %89, %94 : vector<8x128xf32>
    %96 = vector.extract_strided_slice %1 {offsets = [0, 7], sizes = [8, 1], strides = [1, 1]} : vector<8x8xi32> to vector<8x1xi32>
    %97 = vector.broadcast %96 : vector<8x1xi32> to vector<8x128xi32>
    %98 = arith.cmpi eq, %97, %52 : vector<8x128xi32>
    %99 = arith.extui %98 : vector<8x128xi1> to vector<8x128xi32>
    %100 = arith.sitofp %99 : vector<8x128xi32> to vector<8x128xf32>
    %101 = arith.addf %95, %100 : vector<8x128xf32>
    %c0_4 = arith.constant 0 : index
    %c0_5 = arith.constant 0 : index
    %102 = vector.load %arg3[%c0_4, %c0_5] : memref<904x128xbf16, #tpu.memory_space<vmem>>, vector<256x128xbf16>
    %c256 = arith.constant 256 : index
    %c0_6 = arith.constant 0 : index
    %103 = vector.load %arg3[%c256, %c0_6] : memref<904x128xbf16, #tpu.memory_space<vmem>>, vector<128x128xbf16>
    %cst_7 = arith.constant 1.250000e-01 : f32
    %104 = vector.broadcast %cst_7 : f32 to vector<8x256xf32>
    %105 = arith.mulf %51, %104 : vector<8x256xf32>
    %106 = arith.truncf %105 : vector<8x256xf32> to vector<8x256xbf16>
    %cst_8 = arith.constant dense<0.000000e+00> : vector<8x128xf32>
    %107 = tpu.matmul %106, %102, %cst_8 {dimension_numbers = #tpu.dot_dimension_numbers<[1], [0], [0], [1], [0, 0, 1, 1], [], []>} : vector<8x256xbf16>, vector<256x128xbf16>, vector<8x128xf32> -> vector<8x128xf32>
    %cst_9 = arith.constant 1.250000e-01 : f32
    %108 = vector.broadcast %cst_9 : f32 to vector<8x128xf32>
    %109 = arith.mulf %101, %108 : vector<8x128xf32>
    %110 = arith.truncf %109 : vector<8x128xf32> to vector<8x128xbf16>
    %cst_10 = arith.constant dense<0.000000e+00> : vector<8x128xf32>
    %111 = tpu.matmul %110, %103, %cst_10 {dimension_numbers = #tpu.dot_dimension_numbers<[1], [0], [0], [1], [0, 0, 1, 1], [], []>} : vector<8x128xbf16>, vector<128x128xbf16>, vector<8x128xf32> -> vector<8x128xf32>
    %c896 = arith.constant 896 : index
    %c0_11 = arith.constant 0 : index
    %112 = vector.load %arg3[%c896, %c0_11] : memref<904x128xbf16, #tpu.memory_space<vmem>>, vector<1x128xbf16>
    %113 = arith.extf %112 : vector<1x128xbf16> to vector<1x128xf32>
    %114 = arith.truncf %107 : vector<8x128xf32> to vector<8x128xbf16>
    %c384 = arith.constant 384 : index
    %c0_12 = arith.constant 0 : index
    %115 = vector.load %arg3[%c384, %c0_12] : memref<904x128xbf16, #tpu.memory_space<vmem>>, vector<128x128xbf16>
    %cst_13 = arith.constant dense<0.000000e+00> : vector<8x128xf32>
    %116 = tpu.matmul %114, %115, %cst_13 {dimension_numbers = #tpu.dot_dimension_numbers<[1], [0], [0], [1], [0, 0, 1, 1], [], []>} : vector<8x128xbf16>, vector<128x128xbf16>, vector<8x128xf32> -> vector<8x128xf32>
    %117 = vector.broadcast %113 : vector<1x128xf32> to vector<8x128xf32>
    %118 = arith.addf %116, %117 : vector<8x128xf32>
    %119 = math.tanh %118 : vector<8x128xf32>
    %120 = tpu.concatenate %119, %111 in 1 : vector<8x128xf32>, vector<8x128xf32> -> vector<8x256xf32>
    %121 = arith.truncf %120 : vector<8x256xf32> to vector<8x256xbf16>
    %c897 = arith.constant 897 : index
    %c0_14 = arith.constant 0 : index
    %122 = vector.load %arg3[%c897, %c0_14] : memref<904x128xbf16, #tpu.memory_space<vmem>>, vector<1x128xbf16>
    %123 = arith.extf %122 : vector<1x128xbf16> to vector<1x128xf32>
    %c512 = arith.constant 512 : index
    %c0_15 = arith.constant 0 : index
    %124 = vector.load %arg3[%c512, %c0_15] : memref<904x128xbf16, #tpu.memory_space<vmem>>, vector<256x128xbf16>
    %cst_16 = arith.constant dense<0.000000e+00> : vector<8x128xf32>
    %125 = tpu.matmul %121, %124, %cst_16 {dimension_numbers = #tpu.dot_dimension_numbers<[1], [0], [0], [1], [0, 0, 1, 1], [], []>} : vector<8x256xbf16>, vector<256x128xbf16>, vector<8x128xf32> -> vector<8x128xf32>
    %126 = vector.broadcast %123 : vector<1x128xf32> to vector<8x128xf32>
    %127 = arith.addf %125, %126 : vector<8x128xf32>
    %cst_17 = arith.constant 0.000000e+00 : f32
    %128 = vector.broadcast %cst_17 : f32 to vector<8x128xf32>
    %129 = arith.maximumf %127, %128 : vector<8x128xf32>
    %c898 = arith.constant 898 : index
    %c0_18 = arith.constant 0 : index
    %130 = vector.load %arg3[%c898, %c0_18] : memref<904x128xbf16, #tpu.memory_space<vmem>>, vector<1x128xbf16>
    %131 = arith.extf %130 : vector<1x128xbf16> to vector<1x128xf32>
    %132 = arith.truncf %129 : vector<8x128xf32> to vector<8x128xbf16>
    %c768 = arith.constant 768 : index
    %c0_19 = arith.constant 0 : index
    %133 = vector.load %arg3[%c768, %c0_19] : memref<904x128xbf16, #tpu.memory_space<vmem>>, vector<128x128xbf16>
    %cst_20 = arith.constant dense<0.000000e+00> : vector<8x128xf32>
    %134 = tpu.matmul %132, %133, %cst_20 {dimension_numbers = #tpu.dot_dimension_numbers<[1], [0], [0], [1], [0, 0, 1, 1], [], []>} : vector<8x128xbf16>, vector<128x128xbf16>, vector<8x128xf32> -> vector<8x128xf32>
    %135 = vector.broadcast %131 : vector<1x128xf32> to vector<8x128xf32>
    %136 = arith.addf %134, %135 : vector<8x128xf32>
    %c0_21 = arith.constant 0 : index
    %c0_22 = arith.constant 0 : index
    %137 = vector.load %arg4[%c0_21, %c0_22] : memref<8x128xf32, #tpu.memory_space<vmem>>, vector<8x128xf32>
    tpu.vector_store %arg4[%c0_21, %c0_22], %136 {strides = array<i32>} : memref<8x128xf32, #tpu.memory_space<vmem>>, vector<8x128xf32>,
    return
  }
  func.func @transform_0(%arg0: i32) -> (i32, i32) {
    %c0_i32 = arith.constant 0 : i32
    %c0_i32_0 = arith.constant 0 : i32
    return %arg0, %c0_i32 : i32, i32
  }
  func.func @transform_1(%arg0: i32) -> (i32, i32) {
    %c0_i32 = arith.constant 0 : i32
    %c0_i32_0 = arith.constant 0 : i32
    return %arg0, %c0_i32 : i32, i32
  }
  func.func @transform_2(%arg0: i32) -> (i32, i32) {
    %c0_i32 = arith.constant 0 : i32
    %c0_i32_0 = arith.constant 0 : i32
    %c0_i32_1 = arith.constant 0 : i32
    return %c0_i32, %c0_i32_0 : i32, i32
  }
  func.func @transform_3(%arg0: i32) -> (i32, i32) {
    %c0_i32 = arith.constant 0 : i32
    %c0_i32_0 = arith.constant 0 : i32
    return %arg0, %c0_i32 : i32, i32
  }
}

</mosaic_0001>

<bundles_post_ra>
// kernel: synth_forward.1
= control target key start
LH: loop header
LB: loop body
LE: loop exit
PB: predicated region body
PF: predicated region fallthrough
CT: control target
= control target key end

     0   :  { %8 = vsyncpa [#allocation3], 0  ;;  %s1835_s0 = inlined_call_operand.vmem [shape: s32[16,8], index: 0, kind: input, shape index: {}]   ;;  %s1836_s1 = inlined_call_operand.vmem [shape: s32[16,8], index: 1, kind: input, shape index: {}]   ;;  %s1837_s2 = inlined_call_operand.hbm [shape: bf16[904,128], index: 2, kind: input, shape index: {}]   ;;  %s1838_s3 = inlined_call_operand.hbm [shape: f32[16,128], index: 3, kind: output, shape index: {}]  }
   0x1   :  { %9 = vsyncpa [#allocation4], 0 }
   0x2   :  { %11 = vsyncpa [#allocation4 + $0x1], 0  ;;  %s1613_s12 = smov 0   ;;  %s1615_s13 = smov 0  }
   0x3   :  { %s1617_s14 = smov 0   ;;  %s1619_s15 = smov 0  }
   0x4 LB: > { %s1634_s16 = sadd.s32 4294967295, %s1577_s15   ;;  %s1122_s17 = sadd.s32 4294967294, %s1577_s15   ;;  %s1577_s15 = sphi %s1619_s15, %s1854_s15   ;;  %s1573_s14 = sphi %s1617_s14, %s1853_s14   ;;  %s1569_s13 = sphi %s1615_s13, %s1852_s13   ;;  %s1565_s12 = sphi %s1613_s12, %s1851_s12  }
   0x5   : > { %s1638_s18 = sadd.s32 1, %s1577_s15   ;;  %s97_s19 = sadd.s32 1, %s1573_s14 }
   0x6   : > { %s94_s20 = ssub.s32 %s1577_s15, %s1638_s18  ;;  %p107_p0 = scmp.ne.s32.totalorder %s1573_s14, %s1569_s13 }
   0x7   : > { %p95_p1 = scmp.eq.s32.totalorder %s94_s20, 0  ;;  %p108_p2 = scmp.eq.s32.totalorder %s1634_s16, 1 }
   0x8   : > { %p113_p3 = scmp.ne.s32.totalorder %s1569_s13, %s1565_s12  ;;  %p114_p4 = scmp.eq.s32.totalorder %s1122_s17, 1 }
   0x9   : > { %s1649_s21 = scalar_select %p95_p1, %s1573_s14, %s97_s19  }
   0xa   : > { %p1651_p5 = por %p108_p2, %p107_p0  ;;  %p1655_p6 = por %p114_p4, %p113_p3 }
   0xb   : > { %p1123_p7 = scmp.ge.s32.totalorder %s1577_s15, 1  ;;  %p121_p8 = scmp.lt.s32.totalorder %s1577_s15, 3 }
   0xc   : > { %s1842_s22 = scalar_select %p1651_p5, 1, 0 }
   0xd   : > { %s1843_s23 = scalar_select %p1655_p6, 1, 0 }
   0xe   : > { %p1839_p9 = scmp.eq.s32.totalorder %s1634_s16, 0  ;;  %p1662_p10 = pnand %p1123_p7, %p121_p8 }
   0xf   : > { %s1579_s25 = smov [#allocation2]   ;;  %s1483_s30 = scalar_lea.hbm %s1837_s2, 7232 }
  0x10   : > { %s1844_s24 = scalar_select %p1662_p10, 1, 0 }
  0x11   : > { %s133_s26 = sshll.u32 %s1579_s25, 4  ;;  %p1352_p11 = pneg %p1662_p10  ;;  %s134_s26 = int_to_ptr.vmem [resolvable:$true] %s133_s26 }
  0x12   : > { %p1484_p13 = scmp.ne.s32.totalorder %s1837_s2, %s1483_s30  ;;  %p1490_p3 = scmp.lt.u32.totalorder %s1483_s30, %s1837_s2 }
  0x13   : > { %p1670_p12 = pnand %p1839_p9, %p1352_p11 }
  0x15   : > { %p1485_p0 = pneg %p1670_p12 }
  0x17   : > { %p1486_p1 = pnand %p1485_p0, %p1484_p13 }
  0x19   : > { %p1487_p2 = pneg %p1486_p1 }
  0x1b   : > { %p1492_p4 = pnand %p1490_p3, %p1487_p2 }
  0x1d   : > { %1495 = shalt.err (!%p1492_p4)
}
  0x1e   : > { %s1496_s8 = scalar_lea.vmem %s134_s26, 7232  ;;  %p1504_p9 = scmp.lt.s32.totalorder %s134_s26, %s134_s26 }
  0x1f   : > { %p1497_p7 = scmp.ne.s32.totalorder %s134_s26, %s1496_s8  ;;  %p1505_p6 = scmp.lt.s32.totalorder %s1496_s8, %s1496_s8 }
  0x21   : > { %p1499_p8 = pnand %p1497_p7, %p1485_p0  ;;  %p1506_p5 = por %p1505_p6, %p1504_p9 }
  0x23   : > { %p1500_p11 = pneg %p1499_p8 }
  0x25   : > { %p1507_p10 = pnand %p1506_p5, %p1500_p11 }
  0x27   : > { %1510 = shalt.err (!%p1507_p10)
}
  0x28   : > { %s1580_s9 = smov 64   ;;  %s1581_s10 = smov 4  }
  0x29   : > { %1355 = dma.hbm_to_vmem [thread:$0]  (!%p1670_p12), %s1837_s2, 7232, %s134_s26, [#allocation3], %s1580_s9, %s1580_s9, %s1581_s10  }
  0x2a   : > { %p1846_p13 = scmp.ne.s32.totalorder %s1844_s24, 0 }
  0x2b   : > { %p1847_p1 = scmp.eq.s32.totalorder (!%p1846_p13), %s1634_s16, 0 }
  0x2c   : > { %163 = sbr.rel (%p1846_p13) target bundleno = 1109 (0x455), region = 32 }
  0x33   : > { %1556 = dma.done.wait (%p1847_p1), [#allocation3], 7232   ;;  %p1848_p0 = pmov %p1847_p1 }
  0x34   : > { %p190_p5 = scmp.lt.s32.totalorder %s1634_s16, 1  ;;  %v1582_v0 = vmov 2   ;;  %v1583_v1 = vmov 0   ;;  %v1584_v2 = vmov 0.0   ;;  %v1425_v4 = vld [vmem:[#allocation2 + $0x40] sm:$0xff]   ;;  %v1427_v6 = vld [vmem:[#allocation2 + $0x48] sm:$0xff]   ;;  %v201_v33 = vlaneseq }
  0x35   : > { %1558 = vsyncadd (%p1848_p0), [#allocation3], 4294960064  ;;  %1410 = vset.pattern.permute.xlu1 %v1582_v0  ;;  %1408 = vset.pattern.permute.xlu0 %v1583_v1  ;;  %v1426_v5 = vld [vmem:[#allocation2] sm:$0xff]   ;;  %v1428_v7 = vld [vmem:[#allocation2 + $0x8] sm:$0xff]   ;;  %v1585_v8 = vmov 3   ;;  %v1586_v9 = vmov 1  }
  0x36   : > { %s1699_s19 = scalar_select %p190_p5, %s1634_s16, 1  ;;  %1286 = vmatprep.subr.bf16.mxu1 %v1584_v2  ;;  %1215 = vmatprep.subr.bf16.mxu0 %v1425_v4  ;;  %v1429_v10 = vld [vmem:[#allocation2 + $0x50] sm:$0xff]   ;;  %v1431_v12 = vld [vmem:[#allocation2 + $0x58] sm:$0xff]   ;;  %v1587_v13 = vmov 4   ;;  %v1588_v14 = vmov 5   ;;  %v1433_v16 = vld [vmem:[#allocation2 + $0x60] sm:$0xff]  }
  0x37   : > { %1216 = vmatpush3.bf16.msra.mxu0 %v1426_v5  ;;  %v1430_v11 = vld [vmem:[#allocation2 + $0x10] sm:$0xff]   ;;  %v1432_v15 = vld [vmem:[#allocation2 + $0x18] sm:$0xff]   ;;  %v1589_v17 = vmov 6   ;;  %v1434_v18 = vld [vmem:[#allocation2 + $0x20] sm:$0xff]   ;;  %v1590_v20 = vmov 7   ;;  %v1722_v34 = vand.u32 127, %v201_v33 }
  0x38   : > { %s1129_s20 = sshll.u32 %s1699_s19, 3  ;;  %1217 = vmatprep.subr.bf16.mxu0 %v1427_v6  ;;  %v1435_v19 = vld [vmem:[#allocation2 + $0x68] sm:$0xff]   ;;  %v1437_v22 = vld [vmem:[#allocation2 + $0x70] sm:$0xff]   ;;  %v1439_v24 = vld [vmem:[#allocation2 + $0x78] sm:$0xff]   ;;  %s187_s30 = sand.u32 1, %s1569_s13  }
  0x39   : > { %s193_s26 = scalar_lea.vmem %s1835_s0, %s1129_s20  ;;  %v1436_v21 = vld [vmem:[#allocation2 + $0x28] sm:$0xff]   ;;  %v1438_v23 = vld [vmem:[#allocation2 + $0x30] sm:$0xff]   ;;  %v1440_v25 = vld [vmem:[#allocation2 + $0x38] sm:$0xff]   ;;  %s197_s29 = scalar_lea.vmem %s1836_s1, %s1129_s20  ;;  %v203_v37 = vadd.s32 128, %v1722_v34 }
  0x3a   : > { %v199_v3 = vld [vmem:[%s193_s26] sm:$0xff]  ;;  %v1444_v28 = vld [vmem:[#allocation2 + $0x88] sm:$0xff]   ;;  %v1446_v29 = vld [vmem:[#allocation2 + $0x90] sm:$0xff]   ;;  %s1128_s4 = sshll.u32 %s187_s30, 3  ;;  %s1212_s5 = sshll.u32 %s1634_s16, 7 }
  0x3b   : > { %227 = vperm.xlu1 %1410, %v199_v3   ;;  %205 = vperm.xlu0 %1408, %v199_v3   ;;  %v200_v26 = vld [vmem:[%s197_s29] sm:$0xff]  ;;  %v1448_v30 = vld [vmem:[#allocation2 + $0x98] sm:$0xff]   ;;  %v1452_v32 = vld [vmem:[#allocation2 + $0xa8] sm:$0xff]   ;;  %s189_s6 = scalar_lea.vmem [#allocation5], %s1128_s4  ;;  %s1793_s10 = scalar_lea.hbm %s1838_s3, %s1212_s5 }
  0x3c   : > { %1218 = vmatpush3.bf16.msra.mxu0 %v1428_v7  ;;  %v1442_v27 = vld [vmem:[#allocation2 + $0x80] sm:$0xff]   ;;  %s1039_s7 = sshll.u32 %s189_s6, 4  ;;  %s1026_s11 = scalar_lea.sflag [#allocation4], %s187_s30  ;;  %s1795_s7 = int_to_ptr.vmem [resolvable:$true] %s1039_s7 }
  0x3d   : > { %1219 = vmatprep.subr.bf16.mxu0 %v1429_v10  ;;  %1287 = vmatpush3.bf16.msra.mxu1 %v1442_v27  ;;  %v1450_v31 = vld [vmem:[#allocation2 + $0xa0] sm:$0xff]   ;;  %s1511_s16 = scalar_lea.vmem %s1795_s7, 128  ;;  %p1849_p9 = scmp.ne.s32.totalorder %s1842_s22, 0 }
  0x3e   : > { %1288 = vmatprep.subr.bf16.mxu1 %v1584_v2  ;;  %p1512_p6 = scmp.ne.s32.totalorder %s1795_s7, %s1511_s16  ;;  %s1592_s17 = smov [#allocation5]  }
  0x3f   : > { %1411 = vset.pattern.permute.xlu1 %v1585_v8  ;;  %1409 = vset.pattern.permute.xlu0 %v1586_v9  ;;  %s1515_s19 = sshll.u32 %s1592_s17, 4  ;;  %s1516_s19 = int_to_ptr.vmem [resolvable:$false] %s1515_s19 }
  0x40   : > { %238 = vperm.xlu1 %1411, %v199_v3   ;;  %216 = vperm.xlu0 %1409, %v199_v3   ;;  %p1513_p10 = pnand %p1512_p6, %p1849_p9  ;;  %s1517_s20 = scalar_lea.vmem %s1516_s19, 256 }
  0x41   : > { %1220 = vmatpush3.bf16.msra.mxu0 %v1430_v11  ;;  %1289 = vmatpush3.bf16.msra.mxu1 %v1444_v28  ;;  %p1518_p2 = scmp.lt.s32.totalorder %s1795_s7, %s1516_s19  ;;  %p1519_p3 = scmp.lt.s32.totalorder %s1517_s20, %s1511_s16 }
  0x42   : > { %1221 = vmatprep.subr.bf16.mxu0 %v1431_v12  ;;  %1290 = vmatprep.subr.bf16.mxu1 %v1584_v2  ;;  %p1514_p12 = pneg %p1513_p10 }
  0x43   : > { %p1520_p4 = por %p1519_p3, %p1518_p2 }
  0x44   : > { %1412 = vset.pattern.permute.xlu1 %v1587_v13  ;;  %1413 = vset.pattern.permute.xlu0 %v1588_v14 }
  0x45   : > { %249 = vperm.xlu1 %1412, %v199_v3   ;;  %260 = vperm.xlu0 %1413, %v199_v3   ;;  %p1521_p7 = pnand %p1520_p4, %p1514_p12 }
  0x46   : > { %1222 = vmatpush3.bf16.msra.mxu0 %v1432_v15  ;;  %1291 = vmatpush3.bf16.msra.mxu1 %v1446_v29  ;;  %v1441_v15 = vld [vmem:[#allocation2 + $0xc0] sm:$0xff]  }
  0x47   : > { %1223 = vmatprep.subr.bf16.mxu0 %v1433_v16  ;;  %1292 = vmatprep.subr.bf16.mxu1 %v1584_v2  ;;  %v1443_v16 = vld [vmem:[#allocation2 + $0xc8] sm:$0xff]  }
  0x49   : > { %1414 = vset.pattern.permute.xlu1 %v1589_v17  ;;  %1416 = vset.pattern.permute.xlu0 %v1583_v1 }
  0x4a   : > { %271 = vperm.xlu1 %1414, %v199_v3   ;;  %1224 = vmatpush3.bf16.msra.mxu0 %v1434_v18  ;;  %v1447_v18 = vld [vmem:[#allocation2 + $0xd8] sm:$0xff]  }
  0x4b   : > { %1225 = vmatprep.subr.bf16.mxu0 %v1435_v19  ;;  %293 = vperm.xlu0 %1416, %v200_v26   ;;  %v1449_v19 = vld [vmem:[#allocation2 + $0xe0] sm:$0xff]  }
  0x4c   : > { %1293 = vmatpush3.bf16.msra.mxu1 %v1448_v30 }
  0x4d   : > { %1294 = vmatprep.subr.bf16.mxu1 %v1584_v2 }
  0x4e   : > { %1415 = vset.pattern.permute.xlu1 %v1590_v20  ;;  %1226 = vmatpush3.bf16.msra.mxu0 %v1436_v21  ;;  %v1453_v21 = vld [vmem:[#allocation2 + $0xf0] sm:$0xff]  }
  0x4f   : > { %282 = vperm.xlu1 %1415, %v199_v3   ;;  %1227 = vmatprep.subr.bf16.mxu0 %v1437_v22 }
  0x50   : > { %1419 = vset.pattern.permute.xlu0 %v1585_v8  ;;  %1295 = vmatpush3.bf16.msra.mxu1 %v1450_v31 }
  0x51   : > { %314 = vperm.xlu0 %1419, %v200_v26   ;;  %1296 = vmatprep.subr.bf16.mxu1 %v1584_v2 }
  0x52   : > { %1228 = vmatpush3.bf16.msra.mxu0 %v1438_v23 }
  0x53   : > { %1417 = vset.pattern.permute.xlu1 %v1586_v9  ;;  %1229 = vmatprep.subr.bf16.mxu0 %v1439_v24 }
  0x54   : > { %300 = vperm.xlu1 %1417, %v200_v26   ;;  %1297 = vmatpush3.bf16.msra.mxu1 %v1452_v32 }
  0x55   : > { %1422 = vset.pattern.permute.xlu0 %v1589_v17  ;;  %1298 = vmatprep.subr.bf16.mxu1 %v1584_v2  ;;  %v1445_v17 = vld [vmem:[#allocation2 + $0xd0] sm:$0xff]  }
  0x56   : > { %1230 = vmatpush3.bf16.msra.mxu0 %v1440_v25  ;;  %335 = vperm.xlu0 %1422, %v200_v26  }
  0x57   : > { %1306 = vmatprep.subr.bf16.mxu0 %v1584_v2 }
  0x58   : > { %1418 = vset.pattern.permute.xlu1 %v1582_v0 }
  0x59   : > { %307 = vperm.xlu1 %1418, %v200_v26  }
  0x5a   : > { %1424 = vset.pattern.permute.xlu0 %v1590_v20 }
  0x5d   : > { %1420 = vset.pattern.permute.xlu1 %v1587_v13 }
  0x5e   : > { %321 = vperm.xlu1 %1420, %v200_v26  }
  0x62   : > { %1421 = vset.pattern.permute.xlu1 %v1588_v14 }
  0x63   : > { %328 = vperm.xlu1 %1421, %v200_v26  }
  0x67   : > { %1423 = vset.pattern.permute.xlu1 %v1590_v20  ;;  %v1451_v20 = vld [vmem:[#allocation2 + $0xe8] sm:$0xff]  }
  0x68   : > { %342 = vperm.xlu1 %1423, %v200_v26  }
  0xba   : > { %v228_v35 = vpop.permute.xlu1 %227  ;;  %v206_v36 = vpop.permute.xlu0 %205 }
  0xbb   : > { %vm207_vm0 = vcmp.eq.s32.totalorder %v206_v36, %v1722_v34  ;;  %vm208_vm1 = vcmp.eq.s32.totalorder %v206_v36, %v203_v37  ;;  %vm229_vm2 = vcmp.eq.s32.totalorder %v228_v35, %v1722_v34  ;;  %vm230_vm3 = vcmp.eq.s32.totalorder %v228_v35, %v203_v37 }
  0xbc   : > { %v1131_v40 = vsel %vm207_vm0, 1.0, %v1584_v2  ;;  %v1132_v41 = vsel %vm208_vm1, 1.0, %v1584_v2  ;;  %v1135_v46 = vsel %vm229_vm2, 1.0, %v1584_v2  ;;  %v1136_v47 = vsel %vm230_vm3, 1.0, %v1584_v2 }
  0xbf   : > { %v239_v38 = vpop.permute.xlu1 %238  ;;  %v217_v39 = vpop.permute.xlu0 %216 }
  0xc0   : > { %vm218_vm4 = vcmp.eq.s32.totalorder %v217_v39, %v1722_v34  ;;  %vm219_vm5 = vcmp.eq.s32.totalorder %v217_v39, %v203_v37  ;;  %vm240_vm6 = vcmp.eq.s32.totalorder %v239_v38, %v1722_v34  ;;  %vm241_vm7 = vcmp.eq.s32.totalorder %v239_v38, %v203_v37 }
  0xc1   : > { %v1133_v42 = vsel %vm218_vm4, 1.0, %v1584_v2  ;;  %v1134_v43 = vsel %vm219_vm5, 1.0, %v1584_v2  ;;  %v1137_v48 = vsel %vm240_vm6, 1.0, %v1584_v2  ;;  %v1138_v49 = vsel %vm241_vm7, 1.0, %v1584_v2 }
  0xc2   : > { %v224_v44 = vadd.f32 %v1133_v42, %v1131_v40  ;;  %v225_v45 = vadd.f32 %v1134_v43, %v1132_v41 }
  0xc4   : > { %v235_v50 = vadd.f32 %v1135_v46, %v224_v44  ;;  %v236_v51 = vadd.f32 %v1136_v47, %v225_v45  ;;  %v250_v52 = vpop.permute.xlu1 %249  ;;  %v261_v53 = vpop.permute.xlu0 %260  ;;  %v1454_v47 = vld [vmem:[#allocation2 + $0xb0] sm:$0xff]  }
  0xc5   : > { %vm251_vm8 = vcmp.eq.s32.totalorder %v250_v52, %v1722_v34  ;;  %vm252_vm9 = vcmp.eq.s32.totalorder %v250_v52, %v203_v37  ;;  %vm262_vm10 = vcmp.eq.s32.totalorder %v261_v53, %v1722_v34  ;;  %vm263_vm11 = vcmp.eq.s32.totalorder %v261_v53, %v203_v37  ;;  %1299 = vmatpush3.bf16.msra.mxu1 %v1454_v47  ;;  %v1458_v52 = vld [vmem:[#allocation2 + $0x100] sm:$0xff]   ;;  %v1459_v53 = vld [vmem:[#allocation2 + $0x148] sm:$0xff]  }
  0xc6   : > { %v246_v54 = vadd.f32 %v1137_v48, %v235_v50  ;;  %v247_v55 = vadd.f32 %v1138_v49, %v236_v51  ;;  %v1139_v56 = vsel %vm251_vm8, 1.0, %v1584_v2  ;;  %v1140_v57 = vsel %vm252_vm9, 1.0, %v1584_v2  ;;  %1300 = vmatprep.subr.bf16.mxu1 %v1584_v2  ;;  %v1455_v49 = vld [vmem:[#allocation2 + $0xf8] sm:$0xff]  }
  0xc7   : > { %v1141_v60 = vsel %vm262_vm10, 1.0, %v1584_v2  ;;  %v1142_v61 = vsel %vm263_vm11, 1.0, %v1584_v2  ;;  %v1456_v50 = vld [vmem:[#allocation2 + $0xb8] sm:$0xff]   ;;  %vm1591_vm8 = vmmov 0  }
  0xc8   : > { %v257_v58 = vadd.f32 %v1139_v56, %v246_v54  ;;  %v258_v59 = vadd.f32 %v1140_v57, %v247_v55  ;;  %1302 = vmatprep.mubr.msk.bf16.mxu1 %vm1591_vm8, %v1584_v2  ;;  %v1460_v54 = vld [vmem:[#allocation2 + $0x108] sm:$0xff]   ;;  %v1461_v55 = vld [vmem:[#allocation2 + $0x150] sm:$0xff]   ;;  %v1463_v57 = vld [vmem:[#allocation2 + $0x158] sm:$0xff]  }
  0xc9   : > { %v272_v62 = vpop.permute.xlu1 %271  ;;  %1301 = vmatpush3.bf16.msra.mxu1 %v1456_v50  ;;  %v1462_v56 = vld [vmem:[#allocation2 + $0x110] sm:$0xff]  }
  0xca   : > { %vm273_vm12 = vcmp.eq.s32.totalorder %v272_v62, %v1722_v34  ;;  %vm274_vm13 = vcmp.eq.s32.totalorder %v272_v62, %v203_v37  ;;  %v268_v63 = vadd.f32 %v1141_v60, %v257_v58  ;;  %v269_v0 = vadd.f32 %v1142_v61, %v258_v59  ;;  %v294_v23 = vpop.permute.xlu0 %293  ;;  %v1464_v58 = vld [vmem:[#allocation2 + $0x118] sm:$0xff]  }
  0xcb   : > { %v1143_v1 = vsel %vm273_vm12, 1.0, %v1584_v2  ;;  %v1144_v3 = vsel %vm274_vm13, 1.0, %v1584_v2  ;;  %vm295_vm1 = vcmp.eq.s32.totalorder %v294_v23, %v1722_v34 }
  0xcc   : > { %v279_v5 = vadd.f32 %v1143_v1, %v268_v63  ;;  %v280_v6 = vadd.f32 %v1144_v3, %v269_v0  ;;  %v1147_v26 = vsel %vm295_vm1, 1.0, %v1584_v2  ;;  %v1465_v1 = vld [vmem:[#allocation2 + $0x160] sm:$0xff]  }
  0xcd   : > { %v1466_v3 = vld [vmem:[#allocation2 + $0x120] sm:$0xff]  }
  0xce   : > { %v283_v4 = vpop.permute.xlu1 %282 }
  0xcf   : > { %vm284_vm14 = vcmp.eq.s32.totalorder %v283_v4, %v1722_v34  ;;  %vm285_vm15 = vcmp.eq.s32.totalorder %v283_v4, %v203_v37 }
  0xd0   : > { %v1145_v7 = vsel %vm284_vm14, 1.0, %v1584_v2  ;;  %v1146_v8 = vsel %vm285_vm15, 1.0, %v1584_v2  ;;  %v315_v27 = vpop.permute.xlu0 %314 }
  0xd1   : > { %v290_v9 = vadd.f32 %v1145_v7, %v279_v5  ;;  %v291_v10 = vadd.f32 %v1146_v8, %v280_v6  ;;  %vm316_vm3 = vcmp.eq.s32.totalorder %v315_v27, %v1722_v34  ;;  %v1467_v6 = vld [vmem:[#allocation2 + $0x168] sm:$0xff]  }
  0xd2   : > { %v1150_v32 = vsel %vm316_vm3, 1.0, %v1584_v2  ;;  %v1468_v8 = vld [vmem:[#allocation2 + $0x128] sm:$0xff]  }
  0xd3   : > { %v396_v11 = vmul.f32 0.125, %v290_v9  ;;  %v397_v12 = vmul.f32 0.125, %v291_v10  ;;  %v301_v22 = vpop.permute.xlu1 %300 }
  0xd4   : > { %vm302_vm0 = vcmp.eq.s32.totalorder %v301_v22, %v1722_v34  ;;  %v626_v22 = vld [vmem:[#allocation2 + $0x1c0] sm:$0x1] }
  0xd5   : > { %v399_v13 = vpack.c.bf16 %v397_v12, %v397_v12  ;;  %v398_v14 = vpack.c.bf16 %v396_v11, %v396_v11  ;;  %v1148_v25 = vsel %vm302_vm0, 1.0, %v1584_v2  ;;  %v336_v38 = vpop.permute.xlu0 %335  ;;  %v1469_v11 = vld [vmem:[#allocation2 + $0x170] sm:$0xff]   ;;  %v627_v23 = vunpack.c.l.bf16 %v626_v22 }
  0xd6   : > { %v305_v28 = vadd.f32 %v1148_v25, %v1147_v26  ;;  %vm337_vm6 = vcmp.eq.s32.totalorder %v336_v38, %v1722_v34  ;;  %v1470_v12 = vld [vmem:[#allocation2 + $0x130] sm:$0xff]  }
  0xd7   : > { %528 = vmatprep.mubr.bf16.mxu0 %v399_v13  ;;  %v1153_v43 = vsel %vm337_vm6, 1.0, %v1584_v2  ;;  %v1471_v13 = vld [vmem:[#allocation2 + $0x178] sm:$0xff]  }
  0xd8   : > { %529 = vmatmul.mubr.bf16.vlgmr.msra.gmra.mrb[0].mxu0 %v398_v14  ;;  %v308_v24 = vpop.permute.xlu1 %307  ;;  %v1472_v14 = vld [vmem:[#allocation2 + $0x138] sm:$0xff]  }
  0xd9   : > { %1307 = vmatpush3.bf16.msra.mxu0 %v1441_v15  ;;  %vm309_vm2 = vcmp.eq.s32.totalorder %v308_v24, %v1722_v34  ;;  %1322 = vmatprep.mubr.msk.bf16.mxu0 %vm1591_vm8, %v1584_v2  ;;  %v1473_v15 = vld [vmem:[#allocation2 + $0x180] sm:$0xff]  }
  0xda   : > { %1308 = vmatprep.subr.bf16.mxu0 %v1584_v2  ;;  %v1149_v29 = vsel %vm309_vm2, 1.0, %v1584_v2 }
  0xdb   : > { %v312_v31 = vadd.f32 %v1149_v29, %v305_v28 }
  0xdd   : > { %1309 = vmatpush3.bf16.msra.mxu0 %v1443_v16  ;;  %v322_v30 = vpop.permute.xlu1 %321  ;;  %v319_v36 = vadd.f32 %v1150_v32, %v312_v31  ;;  %v1474_v16 = vld [vmem:[#allocation2 + $0x188] sm:$0xff]  }
  0xde   : > { %1310 = vmatprep.subr.bf16.mxu0 %v1584_v2  ;;  %vm323_vm4 = vcmp.eq.s32.totalorder %v322_v30, %v1722_v34 }
  0xdf   : > { %v1151_v37 = vsel %vm323_vm4, 1.0, %v1584_v2 }
  0xe0   : > { %v326_v39 = vadd.f32 %v1151_v37, %v319_v36  ;;  %v1480_v36 = vld [vmem:[#allocation2 + $0x1b8] sm:$0xff]  }
  0xe1   : > { %1311 = vmatpush3.bf16.msra.mxu0 %v1445_v17  ;;  %v1475_v17 = vld [vmem:[#allocation2 + $0x190] sm:$0xff]  }
  0xe2   : > { %1312 = vmatprep.subr.bf16.mxu0 %v1584_v2  ;;  %v329_v35 = vpop.permute.xlu1 %328 }
  0xe3   : > { %vm330_vm5 = vcmp.eq.s32.totalorder %v329_v35, %v1722_v34  ;;  %v1479_v35 = vld [vmem:[#allocation2 + $0x1b0] sm:$0xff]  }
  0xe4   : > { %v1152_v40 = vsel %vm330_vm5, 1.0, %v1584_v2 }
  0xe5   : > { %1313 = vmatpush3.bf16.msra.mxu0 %v1447_v18  ;;  %v333_v42 = vadd.f32 %v1152_v40, %v326_v39  ;;  %v1476_v18 = vld [vmem:[#allocation2 + $0x198] sm:$0xff]  }
  0xe6   : > { %1314 = vmatprep.subr.bf16.mxu0 %v1584_v2 }
  0xe7   : > { %v343_v41 = vpop.permute.xlu1 %342  ;;  %v340_v44 = vadd.f32 %v1153_v43, %v333_v42 }
  0xe8   : > { %vm344_vm7 = vcmp.eq.s32.totalorder %v343_v41, %v1722_v34  ;;  %v1457_v34 = vld [vmem:[#allocation2 + $0x140] sm:$0xff]  }
  0xe9   : > { %1315 = vmatpush3.bf16.msra.mxu0 %v1449_v19  ;;  %v1154_v45 = vsel %vm344_vm7, 1.0, %v1584_v2  ;;  %1255 = vmatprep.subr.bf16.mxu1 %v1457_v34  ;;  %v1477_v19 = vld [vmem:[#allocation2 + $0x1a0] sm:$0xff]  }
  0xea   : > { %1316 = vmatprep.subr.bf16.mxu0 %v1584_v2  ;;  %v347_v46 = vadd.f32 %v1154_v45, %v340_v44 }
  0xec   : > { %v536_v48 = vmul.f32 0.125, %v347_v46  ;;  %v913_v46 = vld [vmem:[#allocation2 + $0x1c0] sm:$0x2] }
  0xed   : > { %1317 = vmatpush3.bf16.msra.mxu0 %v1451_v20  ;;  %v1478_v20 = vld [vmem:[#allocation2 + $0x1a8] sm:$0xff]   ;;  %v914_v47 = vunpack.c.l.bf16 %v913_v46 }
  0xee   : > { %1318 = vmatprep.subr.bf16.mxu0 %v1584_v2  ;;  %v537_v51 = vpack.c.bf16 %v536_v48, %v536_v48 }
  0xf0   : > { %1303 = vmatmul.mubr.bf16.vlgmr.msra.gmra.mrb[0].mxu1 %v537_v51 }
  0xf1   : > { %1319 = vmatpush3.bf16.msra.mxu0 %v1453_v21  ;;  %1256 = vmatpush3.bf16.msra.mxu1 %v1458_v52  ;;  %v646_v21 = vshrl.u32 %v201_v33, 7 }
  0xf2   : > { %1320 = vmatprep.subr.bf16.mxu0 %v1584_v2  ;;  %1257 = vmatprep.subr.bf16.mxu1 %v1459_v53 }
  0xf3   : > { %v647_v24 = vsub.s32 0, %v646_v21  ;;  %v774_v33 = vsub.s32 1, %v646_v21  ;;  %v934_v48 = vsub.s32 2, %v646_v21 }
  0xf5   : > { %1321 = vmatpush3.bf16.msra.mxu0 %v1455_v49  ;;  %1258 = vmatpush3.bf16.msra.mxu1 %v1460_v54  ;;  %v648_v25 = vrot.slane %v627_v23, %v647_v24  ;;  %v775_v38 = vrot.slane %v627_v23, %v774_v33 }
  0xf6   : > { %1326 = vmatprep.subr.bf16.mxu0 %v1584_v2  ;;  %1259 = vmatprep.subr.bf16.mxu1 %v1461_v55 }
  0xf9   : > { %1260 = vmatpush3.bf16.msra.mxu1 %v1462_v56 }
  0xfa   : > { %1261 = vmatprep.subr.bf16.mxu1 %v1463_v57 }
  0xfd   : > { %1262 = vmatpush3.bf16.msra.mxu1 %v1464_v58 }
  0xfe   : > { %1263 = vmatprep.subr.bf16.mxu1 %v1465_v1 }
 0x101   : > { %1264 = vmatpush3.bf16.msra.mxu1 %v1466_v3 }
 0x102   : > { %1265 = vmatprep.subr.bf16.mxu1 %v1467_v6 }
 0x105   : > { %1266 = vmatpush3.bf16.msra.mxu1 %v1468_v8 }
 0x106   : > { %1267 = vmatprep.subr.bf16.mxu1 %v1469_v11 }
 0x109   : > { %1268 = vmatpush3.bf16.msra.mxu1 %v1470_v12 }
 0x10a   : > { %1269 = vmatprep.subr.bf16.mxu1 %v1471_v13 }
 0x10d   : > { %1270 = vmatpush3.bf16.msra.mxu1 %v1472_v14 }
 0x1ab   : > { %v1231_v59 = vpop.f32.mrb[0].mxu0 }
 0x1ac   : > { %v1232_v60 = vpop.f32.mrb[1].mxu0 }
 0x1ad   : > { %v1233_v61 = vadd.f32 %v1232_v60, %v1231_v59  ;;  %v1234_v62 = vpop.f32.mrb[2].mxu0 }
 0x1ae   : > { %v1235_v63 = vpop.f32.mrb[3].mxu0 }
 0x1af   : > { %v628_v0 = vpack.c.bf16 %v1233_v61, %v1233_v61 }
 0x1b1   : > { %1323 = vmatmul.mubr.bf16.vlgmr.msra.gmra.mrb[4].mxu0 %v628_v0 }
 0x1b2   : > { %1342 = vmatprep.mubr.msk.bf16.mxu0 %vm1591_vm8, %v1584_v2  ;;  %1327 = vmatpush3.bf16.msra.mxu0 %v1473_v15 }
 0x1b3   : > { %1328 = vmatprep.subr.bf16.mxu0 %v1584_v2 }
 0x1b6   : > { %1329 = vmatpush3.bf16.msra.mxu0 %v1474_v16 }
 0x1b7   : > { %1330 = vmatprep.subr.bf16.mxu0 %v1584_v2 }
 0x1ba   : > { %1331 = vmatpush3.bf16.msra.mxu0 %v1475_v17 }
 0x1bb   : > { %1332 = vmatprep.subr.bf16.mxu0 %v1584_v2 }
 0x1be   : > { %1333 = vmatpush3.bf16.msra.mxu0 %v1476_v18 }
 0x1bf   : > { %1334 = vmatprep.subr.bf16.mxu0 %v1584_v2 }
 0x1c2   : > { %1335 = vmatpush3.bf16.msra.mxu0 %v1477_v19 }
 0x1c3   : > { %v620_v4 = vpop.f32.mrb[0].mxu1  ;;  %1336 = vmatprep.subr.bf16.mxu0 %v1584_v2 }
 0x1c4   : > { %v1304_v5 = vpop.f32.mrb[1].mxu1  ;;  %v739_v10 = vpack.c.bf16 %v620_v4, %v620_v4 }
 0x1c5   : > { %v623_v7 = vpop.f32.mrb[2].mxu1 }
 0x1c6   : > { %v1305_v9 = vpop.f32.mrb[3].mxu1  ;;  %904 = vmatprep.mubr.bf16.mxu1 %v739_v10  ;;  %1337 = vmatpush3.bf16.msra.mxu0 %v1478_v20 }
 0x1c7   : > { %1338 = vmatprep.subr.bf16.mxu0 %v1584_v2 }
 0x1ca   : > { %1339 = vmatpush3.bf16.msra.mxu0 %v1479_v35 }
 0x1cb   : > { %1340 = vmatprep.subr.bf16.mxu0 %v1584_v2  ;;  %v935_v2 = vrot.slane %v914_v47, %v934_v48 }
 0x1ce   : > { %1341 = vmatpush3.bf16.msra.mxu0 %v1480_v36 }
 0x284   : > { %v731_v26 = vpop.f32.mrb[4].mxu0 }
 0x285   : > { %v732_v27 = vadd.f32 %v731_v26, %v648_v25  ;;  %v1324_v28 = vpop.f32.mrb[5].mxu0 }
 0x286   : > { %v734_v29 = vpop.f32.mrb[6].mxu0 }
 0x287   : > { %1481 = vtanh.f32 %v732_v27  ;;  %v1325_v30 = vpop.f32.mrb[7].mxu0 }
 0x291   : > { %v1482_v31 = vpop.eup %1481 }
 0x292   : > { %v738_v32 = vpack.c.bf16 %v1482_v31, %v1482_v31 }
 0x294   : > { %905 = vmatmul.mubr.bf16.vlgmr.msra.gmra.mrb[4].mxu1 %v738_v32 }
 0x367   : > { %v1271_v37 = vpop.f32.mrb[4].mxu1 }
 0x368   : > { %v1272_v39 = vpop.f32.mrb[5].mxu1 }
 0x369   : > { %v1273_v40 = vadd.f32 %v1272_v39, %v1271_v37  ;;  %v1274_v41 = vpop.f32.mrb[6].mxu1 }
 0x36a   : > { %v1275_v42 = vpop.f32.mrb[7].mxu1 }
 0x36b   : > { %v907_v43 = vadd.f32 %v1273_v40, %v775_v38 }
 0x36d   : > { %v912_v44 = vmax.f32 %v907_v43, 0.0 }
 0x36f   : > { %v915_v45 = vpack.c.bf16 %v912_v44, %v912_v44 }
 0x371   : > { %1343 = vmatmul.mubr.bf16.vlgmr.msra.gmra.mrb[8].mxu0 %v915_v45 }
 0x444   : > { %v1018_v49 = vpop.f32.mrb[8].mxu0 }
 0x445   : > { %v1019_v50 = vadd.f32 %v1018_v49, %v935_v2  ;;  %v1344_v51 = vpop.f32.mrb[9].mxu0 }
 0x446   : > { %v1021_v34 = vpop.f32.mrb[10].mxu0 }
 0x447   : > { %1024 = vst [vmem:[%s189_s6] sm:$0xff] %v1019_v50  ;;  %v1345_v52 = vpop.f32.mrb[11].mxu0 }
 0x448   : > { %1524 = shalt.err (!%p1521_p7)
}
 0x449   : > { %s1525_s24 = scalar_lea.hbm %s1793_s10, 128  ;;  %s1529_s27 = scalar_lea.hbm %s1838_s3, 256 }
 0x44a   : > { %p1526_p8 = scmp.ne.s32.totalorder %s1793_s10, %s1525_s24  ;;  %p1530_p1 = scmp.lt.u32.totalorder %s1793_s10, %s1838_s3 }
 0x44b   : > { %p1531_p0 = scmp.lt.u32.totalorder %s1529_s27, %s1525_s24  ;;  %p1533_p6 = scmp.lt.u32.totalorder %s1525_s24, %s1793_s10 }
 0x44c   : > { %p1527_p11 = pnand %p1526_p8, %p1849_p9 }
 0x44d   : > { %p1532_p5 = por %p1531_p0, %p1530_p1 }
 0x44e   : > { %p1528_p13 = pneg %p1527_p11 }
 0x44f   : > { %p1534_p10 = por %p1533_p6, %p1532_p5 }
 0x451   : > { %p1535_p12 = pnand %p1534_p10, %p1528_p13 }
 0x453   : > { %1538 = shalt.err (!%p1535_p12)
}
 0x454   : > { %1350 = dma.vmem_to_hbm [thread:$0]  (%p1849_p9), %s1795_s7, 128, %s1793_s10, %s1026_s11  }
 0x455 PF: > { %p1362_p2 = scmp.ge.s32.totalorder %s1577_s15, 2  ;;  %s1051_s30 = sand.u32 1, %s1565_s12  }
 0x456   : > { %p1850_p3 = scmp.ne.s32.totalorder %s1843_s23, 0  ;;  %s1052_s4 = scalar_lea.sflag [#allocation4], %s1051_s30 }
 0x458   : > { %p1357_p4 = pnand %p1362_p2, %p1850_p3 }
 0x45a   : > { %1560 = dma.done.wait (!%p1357_p4), %s1052_s4, 128  }
 0x45b   : > { %1562 = vsyncadd (!%p1357_p4), %s1052_s4, 4294967168  ;;  %p14_p7 = scmp.ge.s32.totalorder %s1638_s18, 4   ;;  %s1851_s12 = smov %s1569_s13 }
 0x45c   : > { %s1852_s13 = smov %s1573_s14  ;;  %s1853_s14 = smov %s1649_s21 }
 0x45d   : > { %s1854_s15 = smov %s1638_s18  ;;  %16 = sbr.rel (!%p14_p7) target bundleno = 4 (0x4), region = 75 }
 0x464   :  { %1057 = vsyncpa [#allocation3], 1 }
 0x465   :  { %1059 = vsyncpa [#allocation3 + $0x1], 1 }
 0x466   :  { %1060 = vsyncpa [#allocation4], 1 }
 0x467   :  { %1062 = vsyncpa [#allocation4 + $0x1], 1 }

</bundles_post_ra>
